<compile_context>
chip_gen: v6e
topology: v6e:2x2x1
jax: 0.10.0
libtpu: 0.0.40
codegen_flags: <defaults>
</compile_context>

<pallas_src>
import jax
import jax.numpy as jnp
from jax.experimental import pallas as pl
from jax.experimental.pallas import tpu as pltpu


def _soft_nframes_kernel(times_ref, encs_ref, out_ref):
    # times_ref : (Bblk, N)        float32
    # encs_ref  : (Bblk, N, tD)    compute dtype (f32 or bf16)
    # out_ref   : (Bblk, T, tD)    compute dtype
    b_blk, n_sg = times_ref.shape
    t_len = out_ref.shape[1]

    # Weights are tiny (Bblk*N*T) -> recompute per D-tile so the D grid axis
    # stays fully parallel.  Layout (b, N, T): T is lane-dense.
    t_idx = jax.lax.broadcasted_iota(
        jnp.int32, (b_blk, n_sg, t_len), 2).astype(jnp.float32)
    times = times_ref[...].astype(jnp.float32)[:, :, None]       # (b, N, 1)
    logits = -jnp.abs(t_idx - times)                              # (b, N, T)

    # softmax over T (PyTorch dim=-1 of (B, N, T)) -- dense lane reductions.
    logits = logits - jnp.max(logits, axis=2, keepdims=True)
    e = jnp.exp(logits)
    w = e / jnp.sum(e, axis=2, keepdims=True)                     # (b, N, T) f32

    encs = encs_ref[...]                                          # (b, N, tD)

    if n_sg <= 8:
        # Tiny contraction dim: unrolled VPU multiply-accumulate.  An MXU
        # matmul with K=N=4 pads to 128/256 (~3% utilization); the VPU FMA
        # frees the extended slot in this memory-bound loop.
        acc = w[:, 0, :, None] * encs[:, 0, :].astype(jnp.float32)[:, None, :]
        for n in range(1, n_sg):
            acc = acc + (w[:, n, :, None]
                         * encs[:, n, :].astype(jnp.float32)[:, None, :])
    else:
        # Batched contraction over N on the MXU, f32 accumulation.
        acc = jax.lax.dot_general(
            w, encs,
            dimension_numbers=(((1,), (1,)), ((0,), (0,))),
            preferred_element_type=jnp.float32)                   # (b, T, tD)

    out_ref[...] = acc.astype(out_ref.dtype)


def _choose_tiles(B, N, T, D_pad, enc_bytes, budget_bytes):
    """Pick (b_blk, tD): biggest blocks that fit the VMEM budget."""

    def step_bytes(b_blk, t_d):
        return (2 * b_blk * N * t_d * enc_bytes        # encs block, double-buffered
                + 2 * b_blk * T * t_d * enc_bytes      # out block, double-buffered
                + b_blk * T * t_d * 4                  # f32 accumulator temp
                + 4 * b_blk * N * T * 4)               # softmax temps (tiny)

    # Batch tile must be the full B or a multiple of 8 (second-to-last dim of
    # the 2-D times block); D tiles are multiples of 128 dividing D_pad.
    b_candidates = [B] + [b for b in range(B - 1, 0, -1)
                          if B % b == 0 and b % 8 == 0]
    d_candidates = [d for d in range(D_pad, 0, -128) if D_pad % d == 0]

    for b_blk in b_candidates:
        for t_d in d_candidates:
            if step_bytes(b_blk, t_d) <= budget_bytes:
                return b_blk, t_d
    return b_candidates[-1], 128


def soft_nframes_encodings(sg_times, sg_encs, max_seq_len, *,
                           compute_dtype=None,
                           vmem_budget_bytes=20 * 1024 * 1024):
    """sg_times: (B, N), sg_encs: (B, N, C, H, W) -> (B, T, C, H, W)."""
    B, N, C, H, W = sg_encs.shape
    T = int(max_seq_len)
    D = C * H * W
    enc_dtype = jnp.dtype(compute_dtype) if compute_dtype is not None \
        else jnp.dtype(sg_encs.dtype)
    enc_bytes = enc_dtype.itemsize

    encs_flat = sg_encs.reshape(B, N, D).astype(enc_dtype)

    # Keep the output lane-dense: pad D up to a multiple of 128.
    D_pad = ((D + 127) // 128) * 128
    if D_pad != D:
        encs_flat = jnp.pad(encs_flat, ((0, 0), (0, 0), (0, D_pad - D)))

    b_blk, t_d = _choose_tiles(B, N, T, D_pad, enc_bytes, vmem_budget_bytes)
    grid = (B // b_blk, D_pad // t_d)

    out = pl.pallas_call(
        _soft_nframes_kernel,
        out_shape=jax.ShapeDtypeStruct((B, T, D_pad), enc_dtype),
        grid_spec=pltpu.PrefetchScalarGridSpec(
            num_scalar_prefetch=0,
            grid=grid,
            in_specs=[
                pl.BlockSpec((b_blk, N), lambda bi, di: (bi, 0)),
                pl.BlockSpec((b_blk, N, t_d), lambda bi, di: (bi, 0, di)),
            ],
            out_specs=pl.BlockSpec((b_blk, T, t_d), lambda bi, di: (bi, 0, di)),
        ),
        compiler_params=pltpu.CompilerParams(
            # Both axes independent -> shards across v7x's two TensorCores.
            dimension_semantics=("parallel", "parallel"),
            # Explicit scoped VMEM: above v5e's 16 MiB default, with headroom
            # under v7x's 64 MiB physical VMEM.
            vmem_limit_bytes=32 * 1024 * 1024),
    )(sg_times.astype(jnp.float32), encs_flat)

    if D_pad != D:
        out = out[:, :, :D]
    return out.reshape(B, T, C, H, W)


def soft_nframes_encodings_ref(sg_times, sg_encs, max_seq_len):
    """Plain-JAX reference mirroring the PyTorch code exactly."""
    T = max_seq_len
    target_ind = jnp.arange(T, dtype=sg_times.dtype)
    time_diffs = jnp.abs(target_ind[None, None, :] - sg_times[:, :, None])  # (B,N,T)
    weights = jax.nn.softmax(-time_diffs, axis=-1)                          # (B,N,T)
    weighted = weights[:, :, :, None, None, None] * sg_encs[:, :, None]     # (B,N,T,C,H,W)
    return jnp.sum(weighted, axis=1)                                        # (B,T,C,H,W)


class SoftNFramesRecModuleJAX:
    """JAX/Pallas port of SoftNFramesRecModule.forward (latent interpolation)."""

    def __init__(self, max_seq_len, compute_dtype=None):
        self.max_seq_len = max_seq_len
        self.compute_dtype = compute_dtype

    def forward(self, sg_times, sg_encs):
        encodings = soft_nframes_encodings(
            sg_times, sg_encs, self.max_seq_len, compute_dtype=self.compute_dtype)
        # TODO(synk): self._dense_decode / decoder.decode_seq is an injected
        # external decoder module (not defined here); only the latent
        # interpolation ("encodings") is implemented.
        return {"encodings": encodings}


if __name__ == "__main__":
    # Small shapes consistent with the forward:
    #   B=2 batch, N=4 subgoal segments, T=8 max_seq_len, latent C=4, H=W=8.
    B, N, T, C, H, W = 2, 4, 8, 4, 8, 8

    key = jax.random.PRNGKey(0)
    k1, k2 = jax.random.split(key)
    # subgoal time indices in [0, T), kept as float (softmax needs float logits)
    sg_times = jax.random.randint(k1, (B, N), 0, T).astype(jnp.float32)
    sg_encs = jax.random.normal(k2, (B, N, C, H, W), dtype=jnp.float32)

    ref = jax.block_until_ready(soft_nframes_encodings_ref(sg_times, sg_encs, T))

    # f32 path: strict check against the reference.
    mod = SoftNFramesRecModuleJAX(max_seq_len=T)
    out = mod.forward(sg_times, sg_encs)
    encodings = jax.block_until_ready(out["encodings"])
    assert encodings.shape == (B, T, C, H, W)
    assert jnp.allclose(encodings, ref, atol=1e-5, rtol=1e-5)

    # bf16 path: halves HBM traffic for this memory-bound kernel
    # (accumulation stays f32); loose tolerance vs. the f32 reference.
    enc_bf16 = jax.block_until_ready(
        soft_nframes_encodings(sg_times, sg_encs, T, compute_dtype=jnp.bfloat16))
    assert enc_bf16.dtype == jnp.bfloat16
    assert jnp.allclose(enc_bf16.astype(jnp.float32), ref, atol=5e-2, rtol=5e-2)

    print("KERNEL_OK")
</pallas_src>

<mosaic_0001>
module attributes {stable_mosaic.version = 11 : i64} {
  func.func @_soft_nframes_kernel(%arg0: i32, %arg1: i32, %arg2: memref<2x4xf32, #tpu.memory_space<vmem>>, %arg3: memref<2x4x256xf32, #tpu.memory_space<vmem>>, %arg4: memref<2x8x256xf32, #tpu.memory_space<vmem>>) attributes {dimension_semantics = [#tpu.dimension_semantics<parallel>, #tpu.dimension_semantics<parallel>], iteration_bounds = array<i64: 1, 1>, scalar_prefetch = 0 : i64, scratch_operands = 0 : i64, tpu.core_type = #tpu.core_type<tc>, window_params = [{transform_indices = @transform_0, window_bounds = array<i64: 2, 4>}, {transform_indices = @transform_1, window_bounds = array<i64: 2, 4, 256>}, {transform_indices = @transform_2, window_bounds = array<i64: 2, 8, 256>}]} {
    %0 = tpu.iota {dimensions = array<i32: 2>} : vector<2x4x8xi32>
    %1 = arith.sitofp %0 : vector<2x4x8xi32> to vector<2x4x8xf32>
    %c0 = arith.constant 0 : index
    %c0_0 = arith.constant 0 : index
    %2 = vector.load %arg2[%c0, %c0_0] : memref<2x4xf32, #tpu.memory_space<vmem>>, vector<2x4xf32>
    %3 = vector.shape_cast %2 : vector<2x4xf32> to vector<2x4x1xf32>
    %4 = vector.broadcast %3 : vector<2x4x1xf32> to vector<2x4x8xf32>
    %5 = arith.subf %1, %4 : vector<2x4x8xf32>
    %6 = math.absf %5 : vector<2x4x8xf32>
    %cst = arith.constant 0.000000e+00 : f32
    %7 = vector.broadcast %cst : f32 to vector<2x4x8xf32>
    %8 = arith.subf %7, %6 : vector<2x4x8xf32>
    %cst_1 = arith.constant dense<0xFF800000> : vector<2x4xf32>
    %9 = vector.multi_reduction <maximumf>, %8, %cst_1 [2] : vector<2x4x8xf32> to vector<2x4xf32>
    %10 = vector.shape_cast %9 : vector<2x4xf32> to vector<2x4x1xf32>
    %11 = vector.broadcast %10 : vector<2x4x1xf32> to vector<2x4x8xf32>
    %12 = arith.subf %8, %11 : vector<2x4x8xf32>
    %13 = math.exp %12 : vector<2x4x8xf32>
    %cst_2 = arith.constant dense<0.000000e+00> : vector<2x4xf32>
    %14 = vector.multi_reduction <add>, %13, %cst_2 [2] : vector<2x4x8xf32> to vector<2x4xf32>
    %15 = vector.shape_cast %14 : vector<2x4xf32> to vector<2x4x1xf32>
    %16 = vector.broadcast %15 : vector<2x4x1xf32> to vector<2x4x8xf32>
    %17 = arith.divf %13, %16 : vector<2x4x8xf32>
    %c0_3 = arith.constant 0 : index
    %c0_4 = arith.constant 0 : index
    %c0_5 = arith.constant 0 : index
    %18 = vector.load %arg3[%c0_3, %c0_4, %c0_5] : memref<2x4x256xf32, #tpu.memory_space<vmem>>, vector<2x4x256xf32>
    %19 = vector.extract_strided_slice %17 {offsets = [0, 0, 0], sizes = [2, 1, 8], strides = [1, 1, 1]} : vector<2x4x8xf32> to vector<2x1x8xf32>
    %20 = vector.shape_cast %19 : vector<2x1x8xf32> to vector<2x8xf32>
    %21 = vector.shape_cast %20 : vector<2x8xf32> to vector<2x8x1xf32>
    %22 = vector.extract_strided_slice %18 {offsets = [0, 0, 0], sizes = [2, 1, 256], strides = [1, 1, 1]} : vector<2x4x256xf32> to vector<2x1x256xf32>
    %23 = vector.shape_cast %22 : vector<2x1x256xf32> to vector<2x256xf32>
    %24 = vector.shape_cast %23 : vector<2x256xf32> to vector<2x1x256xf32>
    %25 = vector.broadcast %21 : vector<2x8x1xf32> to vector<2x8x256xf32>
    %26 = vector.broadcast %24 : vector<2x1x256xf32> to vector<2x8x256xf32>
    %27 = arith.mulf %25, %26 : vector<2x8x256xf32>
    %28 = vector.extract_strided_slice %17 {offsets = [0, 1, 0], sizes = [2, 1, 8], strides = [1, 1, 1]} : vector<2x4x8xf32> to vector<2x1x8xf32>
    %29 = vector.shape_cast %28 : vector<2x1x8xf32> to vector<2x8xf32>
    %30 = vector.shape_cast %29 : vector<2x8xf32> to vector<2x8x1xf32>
    %31 = vector.extract_strided_slice %18 {offsets = [0, 1, 0], sizes = [2, 1, 256], strides = [1, 1, 1]} : vector<2x4x256xf32> to vector<2x1x256xf32>
    %32 = vector.shape_cast %31 : vector<2x1x256xf32> to vector<2x256xf32>
    %33 = vector.shape_cast %32 : vector<2x256xf32> to vector<2x1x256xf32>
    %34 = vector.broadcast %30 : vector<2x8x1xf32> to vector<2x8x256xf32>
    %35 = vector.broadcast %33 : vector<2x1x256xf32> to vector<2x8x256xf32>
    %36 = arith.mulf %34, %35 : vector<2x8x256xf32>
    %37 = arith.addf %27, %36 : vector<2x8x256xf32>
    %38 = vector.extract_strided_slice %17 {offsets = [0, 2, 0], sizes = [2, 1, 8], strides = [1, 1, 1]} : vector<2x4x8xf32> to vector<2x1x8xf32>
    %39 = vector.shape_cast %38 : vector<2x1x8xf32> to vector<2x8xf32>
    %40 = vector.shape_cast %39 : vector<2x8xf32> to vector<2x8x1xf32>
    %41 = vector.extract_strided_slice %18 {offsets = [0, 2, 0], sizes = [2, 1, 256], strides = [1, 1, 1]} : vector<2x4x256xf32> to vector<2x1x256xf32>
    %42 = vector.shape_cast %41 : vector<2x1x256xf32> to vector<2x256xf32>
    %43 = vector.shape_cast %42 : vector<2x256xf32> to vector<2x1x256xf32>
    %44 = vector.broadcast %40 : vector<2x8x1xf32> to vector<2x8x256xf32>
    %45 = vector.broadcast %43 : vector<2x1x256xf32> to vector<2x8x256xf32>
    %46 = arith.mulf %44, %45 : vector<2x8x256xf32>
    %47 = arith.addf %37, %46 : vector<2x8x256xf32>
    %48 = vector.extract_strided_slice %17 {offsets = [0, 3, 0], sizes = [2, 1, 8], strides = [1, 1, 1]} : vector<2x4x8xf32> to vector<2x1x8xf32>
    %49 = vector.shape_cast %48 : vector<2x1x8xf32> to vector<2x8xf32>
    %50 = vector.shape_cast %49 : vector<2x8xf32> to vector<2x8x1xf32>
    %51 = vector.extract_strided_slice %18 {offsets = [0, 3, 0], sizes = [2, 1, 256], strides = [1, 1, 1]} : vector<2x4x256xf32> to vector<2x1x256xf32>
    %52 = vector.shape_cast %51 : vector<2x1x256xf32> to vector<2x256xf32>
    %53 = vector.shape_cast %52 : vector<2x256xf32> to vector<2x1x256xf32>
    %54 = vector.broadcast %50 : vector<2x8x1xf32> to vector<2x8x256xf32>
    %55 = vector.broadcast %53 : vector<2x1x256xf32> to vector<2x8x256xf32>
    %56 = arith.mulf %54, %55 : vector<2x8x256xf32>
    %57 = arith.addf %47, %56 : vector<2x8x256xf32>
    %c0_6 = arith.constant 0 : index
    %c0_7 = arith.constant 0 : index
    %c0_8 = arith.constant 0 : index
    %58 = vector.load %arg4[%c0_6, %c0_7, %c0_8] : memref<2x8x256xf32, #tpu.memory_space<vmem>>, vector<2x8x256xf32>
    tpu.vector_store %arg4[%c0_6, %c0_7, %c0_8], %57 {strides = array<i32>} : memref<2x8x256xf32, #tpu.memory_space<vmem>>, vector<2x8x256xf32>,
    return
  }
  func.func @transform_0(%arg0: i32, %arg1: i32) -> (i32, i32) {
    %c0_i32 = arith.constant 0 : i32
    %c0_i32_0 = arith.constant 0 : i32
    return %arg0, %c0_i32 : i32, i32
  }
  func.func @transform_1(%arg0: i32, %arg1: i32) -> (i32, i32, i32) {
    %c0_i32 = arith.constant 0 : i32
    %c0_i32_0 = arith.constant 0 : i32
    return %arg0, %c0_i32, %arg1 : i32, i32, i32
  }
  func.func @transform_2(%arg0: i32, %arg1: i32) -> (i32, i32, i32) {
    %c0_i32 = arith.constant 0 : i32
    %c0_i32_0 = arith.constant 0 : i32
    return %arg0, %c0_i32, %arg1 : i32, i32, i32
  }
}

</mosaic_0001>

<bundles_post_ra>
// kernel: tpu_custom_call.1
= control target key start
LH: loop header
LB: loop body
LE: loop exit
PB: predicated region body
PF: predicated region fallthrough
CT: control target
= control target key end

     0   :  { %7 = vsyncpa [#allocation3], 0  ;;  %s507_s0 = inlined_call_operand.hbm [shape: f32[2,4], index: 0, kind: input, shape index: {}]   ;;  %s508_s1 = inlined_call_operand.hbm [shape: f32[2,4,256], index: 1, kind: input, shape index: {}]   ;;  %s509_s2 = inlined_call_operand.hbm [shape: f32[2,8,256], index: 2, kind: output, shape index: {}]  }
   0x1   :  { %8 = vsyncpa [#allocation6], 0 }
   0x2   :  { %9 = vsyncpa [#allocation4], 0  ;;  %s420_s9 = smov [#allocation2]   ;;  %s421_s11 = smov [#allocation5]  }
   0x3   :  { %s16_s10 = sshll.u32 %s420_s9, 4  ;;  %s25_s12 = sshll.u32 %s421_s11, 4  ;;  %s17_s10 = int_to_ptr.vmem [resolvable:$true] %s16_s10  ;;  %s26_s12 = int_to_ptr.vmem [resolvable:$true] %s25_s12 }
   0x4   :  { %s362_s13 = scalar_lea.vmem %s17_s10, 32  ;;  %p367_p1 = scmp.lt.s32.totalorder %s17_s10, %s17_s10 }
   0x5   :  { %p363_p0 = scmp.ne.s32.totalorder %s17_s10, %s362_s13  ;;  %p368_p2 = scmp.lt.s32.totalorder %s362_s13, %s362_s13 }
   0x7   :  { %p369_p3 = por %p368_p2, %p367_p1 }
   0x9   :  { %p370_p4 = pnand %p369_p3, %p363_p0 }
   0xb   :  { %373 = shalt.err (!%p370_p4)
}
   0xc   :  { %19 = dma.hbm_to_vmem [thread:$0]  %s507_s0, 32, %s17_s10, [#allocation3]  }
   0xd   :  { %s382_s16 = scalar_lea.vmem %s26_s12, 256  ;;  %p387_p6 = scmp.lt.s32.totalorder %s26_s12, %s26_s12 }
   0xe   :  { %p383_p5 = scmp.ne.s32.totalorder %s26_s12, %s382_s16  ;;  %p388_p7 = scmp.lt.s32.totalorder %s382_s16, %s382_s16 }
  0x10   :  { %p389_p8 = por %p388_p7, %p387_p6 }
  0x12   :  { %p390_p9 = pnand %p389_p8, %p383_p5 }
  0x14   :  { %393 = shalt.err (!%p390_p9)
}
  0x15   :  { %s422_s17 = smov 128   ;;  %s423_s18 = smov 8  }
  0x16   :  { %31 = dma.hbm_to_vmem [thread:$0]  %s508_s1, 256, %s26_s12, [#allocation6], %s422_s17, %s422_s17, %s423_s18  }
  0x17   :  { %414 = dma.done.wait [#allocation3], 32  }
  0x18   :  { %415 = vsyncadd [#allocation3], 4294967264 }
  0x19   :  { %416 = dma.done.wait [#allocation6], 256  }
  0x1a   :  { %417 = vsyncadd [#allocation6], 4294967040  ;;  %v38_v0 = vlaneseq  ;;  %v41_v4 = vld [vmem:[#allocation2] sm:$0x3]  ;;  %vm62_vm0 = vcmask 60416   ;;  %v85_v48 = vld [vmem:[#allocation5] sm:$0xff] }
  0x1b   :  { %v86_v58 = vld [vmem:[#allocation5 + $0x8] sm:$0xff]  ;;  %s424_s0 = smov [#allocation7]  }
  0x1c   :  { %v448_v1 = vshrl.u32 %v38_v0, 7  ;;  %v39_v7 = vand.u32 127, %v38_v0  ;;  %s326_s1 = sshll.u32 %s424_s0, 4  ;;  %s327_s1 = int_to_ptr.vmem [resolvable:$true] %s326_s1 }
  0x1d   :  { %s394_s21 = scalar_lea.vmem %s327_s1, 512  ;;  %p399_p11 = scmp.lt.s32.totalorder %s327_s1, %s327_s1 }
  0x1e   :  { %v451_v2 = vsub.s32 0, %v448_v1  ;;  %v454_v3 = vsub.s32 1, %v448_v1  ;;  %v40_v8 = vcvt.s32.f32 %v39_v7  ;;  %v463_v31 = vsub.s32 2, %v448_v1  ;;  %p395_p10 = scmp.ne.s32.totalorder %s327_s1, %s394_s21  ;;  %p400_p12 = scmp.lt.s32.totalorder %s394_s21, %s394_s21 }
  0x1f   :  { %v472_v42 = vsub.s32 3, %v448_v1  ;;  %v163_v46 = vsub.s32 5, %v448_v1  ;;  %v109_v47 = vsub.s32 4, %v448_v1  ;;  %v221_v52 = vsub.s32 6, %v448_v1 }
  0x20   :  { %v45_v5 = vrot.slane %v41_v4, %v451_v2  ;;  %v52_v6 = vrot.slane %v41_v4, %v454_v3  ;;  %v160_v50 = vrot.slane %v85_v48, %v454_v3  ;;  %v106_v53 = vrot.slane %v85_v48, %v451_v2  ;;  %p401_p13 = por %p400_p12, %p399_p11 }
  0x21   :  { %v164_v51 = vrot.slane %v85_v48, %v163_v46  ;;  %v110_v54 = vrot.slane %v85_v48, %v109_v47  ;;  %v279_v59 = vsub.s32 7, %v448_v1  ;;  %v218_v60 = vrot.slane %v85_v48, %v463_v31 }
  0x22   :  { %47 = vbcast.lane.b32.xlu0 %v45_v5, 256  ;;  %v180_v55 = vrot.slane %v160_v50, %v454_v3  ;;  %v222_v61 = vrot.slane %v85_v48, %v221_v52  ;;  %v126_v62 = vrot.slane %v106_v53, %v451_v2  ;;  %v168_v0 = vrot.slane %v86_v58, %v454_v3  ;;  %p402_p0 = pnand %p401_p13, %p395_p10 }
  0x23   :  { %v184_v56 = vrot.slane %v164_v51, %v454_v3  ;;  %v130_v63 = vrot.slane %v110_v54, %v451_v2  ;;  %v172_v4 = vrot.slane %v86_v58, %v163_v46  ;;  %v114_v5 = vrot.slane %v86_v58, %v451_v2 }
  0x24   :  { %v276_v1 = vrot.slane %v85_v48, %v472_v42 }
  0x26   :  { %54 = vbcast.lane.b32.xlu0 %v52_v6, 256  ;;  %v118_v6 = vrot.slane %v86_v58, %v109_v47 }
  0x94   :  { %v48_v9 = vpop.permute.xlu0 %47 }
  0x95   :  { %v56_v10 = vsub.f32 %v40_v8, %v48_v9 }
  0x97   :  { %v58_v11 = vand.u32 2147483647, %v56_v10  ;;  %v226_v10 = vrot.slane %v86_v58, %v463_v31 }
  0x98   :  { %v55_v12 = vpop.permute.xlu0 %54 }
  0x99   :  { %v60_v13 = vsub.f32 0.0, %v58_v11  ;;  %v57_v14 = vsub.f32 %v40_v8, %v55_v12  ;;  %v230_v11 = vrot.slane %v86_v58, %v221_v52  ;;  %v280_v12 = vrot.slane %v85_v48, %v279_v59 }
  0x9b   :  { %v59_v15 = vand.u32 2147483647, %v57_v14  ;;  %v63_v16 = vsel %vm62_vm0, %v60_v13, -inf  ;;  %v242_v14 = vrot.slane %v222_v61, %v463_v31 }
  0x9c   :  { %64 = vmax.xlane.f32.xlu1 %v63_v16 }
  0x9d   :  { %v61_v17 = vsub.f32 0.0, %v59_v15 }
  0x9f   :  { %v66_v18 = vsel %vm62_vm0, %v61_v17, -inf }
  0xa0   :  { %67 = vmax.xlane.f32.xlu1 %v66_v18  ;;  %v188_v18 = vrot.slane %v168_v0, %v454_v3 }
 0x125   :  { %v65_v19 = vpop.xlane.xlu1 %64 }
 0x126   :  { %v69_v20 = vsub.f32 %v60_v13, %v65_v19  ;;  %v238_v13 = vrot.slane %v218_v60, %v463_v31  ;;  %v192_v19 = vrot.slane %v172_v4, %v454_v3 }
 0x128   :  { %v71_v21 = vmul.f32 1.442695, %v69_v20  ;;  %v284_v20 = vrot.slane %v86_v58, %v472_v42 }
 0x129   :  { %v68_v22 = vpop.xlane.xlu1 %67 }
 0x12a   :  { %346 = vpow2.f32 %v71_v21  ;;  %v70_v23 = vsub.f32 %v61_v17, %v68_v22  ;;  %v288_v21 = vrot.slane %v86_v58, %v279_v59  ;;  %v134_v22 = vrot.slane %v114_v5, %v451_v2 }
 0x12c   :  { %v73_v24 = vmul.f32 1.442695, %v70_v23  ;;  %v138_v23 = vrot.slane %v118_v6, %v451_v2 }
 0x12e   :  { %348 = vpow2.f32 %v73_v24 }
 0x137   :  { %v347_v25 = vpop.eup %346 }
 0x138   :  { %v75_v26 = vsel %vm62_vm0, %v347_v25, 0.0 }
 0x139   :  { %76 = vadd.xlane.f32.xlu0 %v75_v26 }
 0x13b   :  { %v349_v27 = vpop.eup %348 }
 0x13c   :  { %v78_v28 = vsel %vm62_vm0, %v349_v27, 0.0 }
 0x13d   :  { %79 = vadd.xlane.f32.xlu1 %v78_v28  ;;  %v250_v28 = vrot.slane %v230_v11, %v463_v31 }
 0x1c2   :  { %v77_v29 = vpop.xlane.xlu0 %76 }
 0x1c3   :  { %350 = vrcp.f32 %v77_v29  ;;  %v296_v29 = vrot.slane %v276_v1, %v472_v42 }
 0x1c6   :  { %v80_v30 = vpop.xlane.xlu1 %79 }
 0x1c7   :  { %352 = vrcp.f32 %v80_v30  ;;  %v300_v30 = vrot.slane %v280_v12, %v472_v42 }
 0x1d0   :  { %v351_v32 = vpop.eup %350 }
 0x1d1   :  { %v82_v33 = vmul.f32 %v351_v32, %v347_v25 }
 0x1d3   :  { %v204_v34 = vrot.slane %v82_v33, %v463_v31  ;;  %v90_v35 = vrot.slane %v82_v33, %v451_v2  ;;  %v146_v39 = vrot.slane %v82_v33, %v454_v3  ;;  %v262_v43 = vrot.slane %v82_v33, %v472_v42 }
 0x1d4   :  { %v353_v36 = vpop.eup %352 }
 0x1d5   :  { %206 = vbcast.lane.b32.xlu0 %v204_v34, 256  ;;  %92 = vbcast.lane.b32.xlu1 %v90_v35, 256  ;;  %v84_v37 = vmul.f32 %v353_v36, %v349_v27  ;;  %v246_v27 = vrot.slane %v226_v10, %v463_v31  ;;  %v304_v35 = vrot.slane %v284_v20, %v472_v42 }
 0x1d6   :  { %v308_v36 = vrot.slane %v288_v21, %v472_v42 }
 0x1d7   :  { %v97_v38 = vrot.slane %v84_v37, %v451_v2  ;;  %v153_v40 = vrot.slane %v84_v37, %v454_v3  ;;  %v211_v41 = vrot.slane %v84_v37, %v463_v31  ;;  %v269_v44 = vrot.slane %v84_v37, %v472_v42 }
 0x1d9   :  { %99 = vbcast.lane.b32.xlu1 %v97_v38, 256 }
 0x1dd   :  { %148 = vbcast.lane.b32.xlu1 %v146_v39, 256 }
 0x1e1   :  { %155 = vbcast.lane.b32.xlu1 %v153_v40, 256 }
 0x1e5   :  { %213 = vbcast.lane.b32.xlu1 %v211_v41, 256 }
 0x1e9   :  { %264 = vbcast.lane.b32.xlu1 %v262_v43, 256 }
 0x1ed   :  { %271 = vbcast.lane.b32.xlu1 %v269_v44, 256 }
 0x247   :  { %v93_v45 = vpop.permute.xlu1 %92  ;;  %v207_v17 = vpop.permute.xlu0 %206 }
 0x248   :  { %v139_v15 = vmul.f32 %v126_v62, %v93_v45  ;;  %v140_v16 = vmul.f32 %v130_v63, %v93_v45  ;;  %v251_v32 = vmul.f32 %v238_v13, %v207_v17  ;;  %v252_v3 = vmul.f32 %v242_v14, %v207_v17 }
 0x24b   :  { %v100_v49 = vpop.permute.xlu1 %99 }
 0x24c   :  { %v141_v2 = vmul.f32 %v134_v22, %v100_v49  ;;  %v142_v37 = vmul.f32 %v138_v23, %v100_v49 }
 0x24f   :  { %v149_v57 = vpop.permute.xlu1 %148 }
 0x250   :  { %v193_v7 = vmul.f32 %v180_v55, %v149_v57  ;;  %v194_v8 = vmul.f32 %v184_v56, %v149_v57 }
 0x252   :  { %v197_v24 = vadd.f32 %v193_v7, %v139_v15  ;;  %v198_v25 = vadd.f32 %v194_v8, %v140_v16 }
 0x253   :  { %v156_v9 = vpop.permute.xlu1 %155 }
 0x254   :  { %v195_v33 = vmul.f32 %v188_v18, %v156_v9  ;;  %v196_v34 = vmul.f32 %v192_v19, %v156_v9  ;;  %v255_v38 = vadd.f32 %v251_v32, %v197_v24  ;;  %v256_v39 = vadd.f32 %v252_v3, %v198_v25 }
 0x256   :  { %v199_v45 = vadd.f32 %v195_v33, %v141_v2  ;;  %v200_v46 = vadd.f32 %v196_v34, %v142_v37 }
 0x257   :  { %v214_v26 = vpop.permute.xlu1 %213 }
 0x258   :  { %v253_v41 = vmul.f32 %v246_v27, %v214_v26  ;;  %v254_v43 = vmul.f32 %v250_v28, %v214_v26 }
 0x25a   :  { %v257_v51 = vadd.f32 %v253_v41, %v199_v45  ;;  %v258_v52 = vadd.f32 %v254_v43, %v200_v46 }
 0x25b   :  { %v265_v40 = vpop.permute.xlu1 %264 }
 0x25c   :  { %v309_v31 = vmul.f32 %v296_v29, %v265_v40  ;;  %v310_v44 = vmul.f32 %v300_v30, %v265_v40 }
 0x25e   :  { %v313_v47 = vadd.f32 %v309_v31, %v255_v38  ;;  %v314_v48 = vadd.f32 %v310_v44, %v256_v39 }
 0x25f   :  { %v272_v50 = vpop.permute.xlu1 %271 }
 0x260   :  { %317 = vst [vmem:[#allocation7] sm:$0xff] %v313_v47  ;;  %318 = vst [vmem:[#allocation7 + $0x8] sm:$0xff] %v314_v48  ;;  %v311_v42 = vmul.f32 %v304_v35, %v272_v50  ;;  %v312_v49 = vmul.f32 %v308_v36, %v272_v50 }
 0x262   :  { %v315_v53 = vadd.f32 %v311_v42, %v257_v51  ;;  %v316_v54 = vadd.f32 %v312_v49, %v258_v52 }
 0x264   :  { %319 = vst [vmem:[#allocation7 + $0x10] sm:$0xff] %v315_v53  ;;  %320 = vst [vmem:[#allocation7 + $0x18] sm:$0xff] %v316_v54 }
 0x265   :  { %405 = shalt.err (!%p402_p0)
}
 0x266   :  { %s425_s22 = smov 256   ;;  %s426_s23 = smov 16  }
 0x267   :  { %332 = dma.vmem_to_hbm [thread:$0]  %s327_s1, 512, %s509_s2, [#allocation4], %s425_s22, %s425_s22, %s426_s23  }
 0x268   :  { %418 = dma.done.wait [#allocation4], 512  }
 0x269   :  { %419 = vsyncadd [#allocation4], 4294966784 }
 0x26a   :  { %336 = vsyncpa [#allocation3], 1 }
 0x26b   :  { %337 = vsyncpa [#allocation6], 1 }
 0x26c   :  { %338 = vsyncpa [#allocation4], 1 }

</bundles_post_ra>
